<compile_context>
chip_gen: v5e
topology: v5e:2x2
jax: 0.10.0
libtpu: 0.0.40
codegen_flags: <defaults>
</compile_context>

<pallas_src>
import functools

import jax
import jax.numpy as jnp
from jax.experimental import pallas as pl
from jax.experimental.pallas import tpu as pltpu

HIDDEN_1 = 32
HIDDEN_2 = 64
HEAD_PAD = 128  # fused mean|std head output width, padded lane-dense


def _round_up(n: int, m: int) -> int:
    return ((n + m - 1) // m) * m


def _policy_kernel(x_ref, w1_ref, b1_ref, w2_ref, b2_ref, wh_ref, bh_ref,
                   out_ref, *, action_dim: int):
    # Emulates x.float() in the PyTorch forward.
    x = x_ref[...].astype(jnp.float32)

    # Shared trunk: Linear -> Tanh -> Linear -> Tanh  (MXU matmuls, f32 acc).
    h1 = jnp.tanh(
        jnp.dot(x, w1_ref[...], preferred_element_type=jnp.float32) + b1_ref[...]
    )
    h2 = jnp.tanh(
        jnp.dot(h1, w2_ref[...], preferred_element_type=jnp.float32) + b2_ref[...]
    )

    # Fused heads: one matmul into a lane-dense (TB, 128) slab.
    # Lanes [0, action_dim)              -> mean (identity)
    # Lanes [action_dim, 2*action_dim)   -> std  (softplus)
    # Lanes [2*action_dim, 128)          -> zero padding (sliced off outside)
    z = jnp.dot(h2, wh_ref[...], preferred_element_type=jnp.float32) + bh_ref[...]

    # Numerically stable softplus == log(1 + exp(z)).
    sp = jnp.maximum(z, 0.0) + jnp.log1p(jnp.exp(-jnp.abs(z)))

    col = jax.lax.broadcasted_iota(jnp.int32, z.shape, 1)
    is_std = (col >= action_dim) & (col < 2 * action_dim)
    out_ref[...] = jnp.where(is_std, sp, z).astype(out_ref.dtype)


def policy_network_forward(x, params):
    """Fused PolicyNetWork forward pass.

    Args:
      x: (batch, obs_dim) array.
      params: dict with w1,b1,w2,b2,wm,bm,ws,bs (weights in (in, out) layout,
              biases as (1, out)).
    Returns:
      (action_means, action_stddevs), each (batch, action_dim) float32.
    """
    batch, obs_dim = x.shape
    action_dim = params["wm"].shape[1]
    assert 2 * action_dim <= HEAD_PAD

    # Build the fused, lane-padded head weight/bias: [ mean | std | zeros ].
    w_head = jnp.zeros((HIDDEN_2, HEAD_PAD), jnp.float32)
    w_head = w_head.at[:, :action_dim].set(params["wm"].astype(jnp.float32))
    w_head = w_head.at[:, action_dim:2 * action_dim].set(
        params["ws"].astype(jnp.float32))
    b_head = jnp.zeros((1, HEAD_PAD), jnp.float32)
    b_head = b_head.at[:, :action_dim].set(params["bm"].astype(jnp.float32))
    b_head = b_head.at[:, action_dim:2 * action_dim].set(
        params["bs"].astype(jnp.float32))

    # Batch tiling: big tiles amortize the ~0.35 us/step pipeline overhead but
    # stay tiny vs. VMEM (TB=1024 -> ~0.5 MiB/output tile even on v7x).
    tb = min(1024, _round_up(batch, 8))
    padded_batch = _round_up(batch, tb)
    if padded_batch != batch:
        x = jnp.pad(x, ((0, padded_batch - batch), (0, 0)))
    grid = (padded_batch // tb,)

    weight_spec = lambda shape: pl.BlockSpec(shape, lambda i: (0, 0))

    flops = 2 * batch * (obs_dim * HIDDEN_1
                         + HIDDEN_1 * HIDDEN_2
                         + HIDDEN_2 * 2 * action_dim)
    transcendentals = batch * (HIDDEN_1 + HIDDEN_2 + 2 * action_dim)
    weight_bytes = 4 * (obs_dim * HIDDEN_1 + HIDDEN_1
                        + HIDDEN_1 * HIDDEN_2 + HIDDEN_2
                        + HIDDEN_2 * HEAD_PAD + HEAD_PAD)
    bytes_accessed = 4 * padded_batch * (obs_dim + HEAD_PAD) + weight_bytes

    out = pl.pallas_call(
        functools.partial(_policy_kernel, action_dim=action_dim),
        out_shape=jax.ShapeDtypeStruct((padded_batch, HEAD_PAD), jnp.float32),
        grid=grid,
        in_specs=[
            pl.BlockSpec((tb, obs_dim), lambda i: (i, 0)),     # x: tiled
            weight_spec((obs_dim, HIDDEN_1)),                  # w1: resident
            weight_spec((1, HIDDEN_1)),                        # b1
            weight_spec((HIDDEN_1, HIDDEN_2)),                 # w2
            weight_spec((1, HIDDEN_2)),                        # b2
            weight_spec((HIDDEN_2, HEAD_PAD)),                 # fused head W
            weight_spec((1, HEAD_PAD)),                        # fused head b
        ],
        out_specs=pl.BlockSpec((tb, HEAD_PAD), lambda i: (i, 0)),
        compiler_params=pltpu.CompilerParams(
            dimension_semantics=("parallel",)),
        cost_estimate=pl.CostEstimate(
            flops=flops,
            transcendentals=transcendentals,
            bytes_accessed=bytes_accessed),
    )(
        x,
        params["w1"], params["b1"],
        params["w2"], params["b2"],
        w_head, b_head,
    )

    mean = out[:batch, :action_dim]
    std = out[:batch, action_dim:2 * action_dim]
    return mean, std


def init_params(key, obs_dim, action_dim):
    """Deterministic init mimicking nn.Linear default (uniform +/- 1/sqrt(fan_in))."""
    def linear(key, fan_in, fan_out):
        kw, kb = jax.random.split(key)
        bound = 1.0 / jnp.sqrt(jnp.float32(fan_in))
        w = jax.random.uniform(kw, (fan_in, fan_out), jnp.float32, -bound, bound)
        b = jax.random.uniform(kb, (1, fan_out), jnp.float32, -bound, bound)
        return w, b

    k1, k2, k3, k4 = jax.random.split(key, 4)
    w1, b1 = linear(k1, obs_dim, HIDDEN_1)
    w2, b2 = linear(k2, HIDDEN_1, HIDDEN_2)
    wm, bm = linear(k3, HIDDEN_2, action_dim)
    ws, bs = linear(k4, HIDDEN_2, action_dim)
    return dict(w1=w1, b1=b1, w2=w2, b2=b2, wm=wm, bm=bm, ws=ws, bs=bs)


def _reference_forward(x, p):
    """Pure-JAX reference matching the PyTorch module."""
    xf = x.astype(jnp.float32)
    h1 = jnp.tanh(xf @ p["w1"] + p["b1"])
    h2 = jnp.tanh(h1 @ p["w2"] + p["b2"])
    mean = h2 @ p["wm"] + p["bm"]
    std = jnp.log1p(jnp.exp(h2 @ p["ws"] + p["bs"]))
    return mean, std


if __name__ == "__main__":
    obs_dim = 4
    action_dim = 2
    batch = 8

    key = jax.random.PRNGKey(0)
    k_params, k_x = jax.random.split(key)

    params = init_params(k_params, obs_dim, action_dim)
    x = jax.random.normal(k_x, (batch, obs_dim), dtype=jnp.float32)

    mean, std = policy_network_forward(x, params)
    jax.block_until_ready((mean, std))

    ref_mean, ref_std = _reference_forward(x, params)
    assert mean.shape == (batch, action_dim)
    assert std.shape == (batch, action_dim)
    assert jnp.allclose(mean, ref_mean, atol=1e-5, rtol=1e-5)
    assert jnp.allclose(std, ref_std, atol=1e-5, rtol=1e-5)
    assert bool(jnp.all(std > 0))

    # Also exercise a batch that is not a tile multiple (padding path).
    x2 = jax.random.normal(jax.random.PRNGKey(3), (13, obs_dim), jnp.float32)
    m2, s2 = policy_network_forward(x2, params)
    jax.block_until_ready((m2, s2))
    rm2, rs2 = _reference_forward(x2, params)
    assert jnp.allclose(m2, rm2, atol=1e-5, rtol=1e-5)
    assert jnp.allclose(s2, rs2, atol=1e-5, rtol=1e-5)

    print("KERNEL_OK")
</pallas_src>

<mosaic_0001>
module attributes {stable_mosaic.version = 11 : i64} {
  func.func @_policy_kernel(%arg0: i32, %arg1: memref<8x4xf32, #tpu.memory_space<vmem>>, %arg2: memref<4x32xf32, #tpu.memory_space<vmem>>, %arg3: memref<1x32xf32, #tpu.memory_space<vmem>>, %arg4: memref<32x64xf32, #tpu.memory_space<vmem>>, %arg5: memref<1x64xf32, #tpu.memory_space<vmem>>, %arg6: memref<64x128xf32, #tpu.memory_space<vmem>>, %arg7: memref<1x128xf32, #tpu.memory_space<vmem>>, %arg8: memref<8x128xf32, #tpu.memory_space<vmem>>) attributes {dimension_semantics = [#tpu.dimension_semantics<parallel>], iteration_bounds = array<i64: 1>, scalar_prefetch = 0 : i64, scratch_operands = 0 : i64, tpu.core_type = #tpu.core_type<tc>, window_params = [{transform_indices = @transform_0, window_bounds = array<i64: 8, 4>}, {pipeline_mode = #tpu.pipeline_mode<synchronous>, transform_indices = @transform_1, window_bounds = array<i64: 4, 32>}, {pipeline_mode = #tpu.pipeline_mode<synchronous>, transform_indices = @transform_2, window_bounds = array<i64: 1, 32>}, {pipeline_mode = #tpu.pipeline_mode<synchronous>, transform_indices = @transform_3, window_bounds = array<i64: 32, 64>}, {pipeline_mode = #tpu.pipeline_mode<synchronous>, transform_indices = @transform_4, window_bounds = array<i64: 1, 64>}, {pipeline_mode = #tpu.pipeline_mode<synchronous>, transform_indices = @transform_5, window_bounds = array<i64: 64, 128>}, {pipeline_mode = #tpu.pipeline_mode<synchronous>, transform_indices = @transform_6, window_bounds = array<i64: 1, 128>}, {transform_indices = @transform_7, window_bounds = array<i64: 8, 128>}]} {
    %c0 = arith.constant 0 : index
    %c0_0 = arith.constant 0 : index
    %0 = vector.load %arg1[%c0, %c0_0] : memref<8x4xf32, #tpu.memory_space<vmem>>, vector<8x4xf32>
    %c0_1 = arith.constant 0 : index
    %c0_2 = arith.constant 0 : index
    %1 = vector.load %arg2[%c0_1, %c0_2] : memref<4x32xf32, #tpu.memory_space<vmem>>, vector<4x32xf32>
    %cst = arith.constant dense<0.000000e+00> : vector<8x32xf32>
    %2 = tpu.matmul %0, %1, %cst {dimension_numbers = #tpu.dot_dimension_numbers<[1], [0], [0], [1], [0, 0, 1, 1], [], []>} : vector<8x4xf32>, vector<4x32xf32>, vector<8x32xf32> -> vector<8x32xf32>
    %c0_3 = arith.constant 0 : index
    %c0_4 = arith.constant 0 : index
    %3 = vector.load %arg3[%c0_3, %c0_4] : memref<1x32xf32, #tpu.memory_space<vmem>>, vector<1x32xf32>
    %4 = vector.broadcast %3 : vector<1x32xf32> to vector<8x32xf32>
    %5 = arith.addf %2, %4 : vector<8x32xf32>
    %6 = math.tanh %5 : vector<8x32xf32>
    %c0_5 = arith.constant 0 : index
    %c0_6 = arith.constant 0 : index
    %7 = vector.load %arg4[%c0_5, %c0_6] : memref<32x64xf32, #tpu.memory_space<vmem>>, vector<32x64xf32>
    %cst_7 = arith.constant dense<0.000000e+00> : vector<8x64xf32>
    %8 = tpu.matmul %6, %7, %cst_7 {dimension_numbers = #tpu.dot_dimension_numbers<[1], [0], [0], [1], [0, 0, 1, 1], [], []>} : vector<8x32xf32>, vector<32x64xf32>, vector<8x64xf32> -> vector<8x64xf32>
    %c0_8 = arith.constant 0 : index
    %c0_9 = arith.constant 0 : index
    %9 = vector.load %arg5[%c0_8, %c0_9] : memref<1x64xf32, #tpu.memory_space<vmem>>, vector<1x64xf32>
    %10 = vector.broadcast %9 : vector<1x64xf32> to vector<8x64xf32>
    %11 = arith.addf %8, %10 : vector<8x64xf32>
    %12 = math.tanh %11 : vector<8x64xf32>
    %c0_10 = arith.constant 0 : index
    %c0_11 = arith.constant 0 : index
    %13 = vector.load %arg6[%c0_10, %c0_11] : memref<64x128xf32, #tpu.memory_space<vmem>>, vector<64x128xf32>
    %cst_12 = arith.constant dense<0.000000e+00> : vector<8x128xf32>
    %14 = tpu.matmul %12, %13, %cst_12 {dimension_numbers = #tpu.dot_dimension_numbers<[1], [0], [0], [1], [0, 0, 1, 1], [], []>} : vector<8x64xf32>, vector<64x128xf32>, vector<8x128xf32> -> vector<8x128xf32>
    %c0_13 = arith.constant 0 : index
    %c0_14 = arith.constant 0 : index
    %15 = vector.load %arg7[%c0_13, %c0_14] : memref<1x128xf32, #tpu.memory_space<vmem>>, vector<1x128xf32>
    %16 = vector.broadcast %15 : vector<1x128xf32> to vector<8x128xf32>
    %17 = arith.addf %14, %16 : vector<8x128xf32>
    %cst_15 = arith.constant 0.000000e+00 : f32
    %18 = vector.broadcast %cst_15 : f32 to vector<8x128xf32>
    %19 = arith.maximumf %17, %18 : vector<8x128xf32>
    %20 = math.absf %17 : vector<8x128xf32>
    %cst_16 = arith.constant 0.000000e+00 : f32
    %21 = vector.broadcast %cst_16 : f32 to vector<8x128xf32>
    %22 = arith.subf %21, %20 : vector<8x128xf32>
    %23 = math.exp %22 : vector<8x128xf32>
    %24 = math.log1p %23 : vector<8x128xf32>
    %25 = arith.addf %19, %24 : vector<8x128xf32>
    %26 = tpu.iota {dimensions = array<i32: 1>} : vector<8x128xi32>
    %c2_i32 = arith.constant 2 : i32
    %27 = vector.broadcast %c2_i32 : i32 to vector<8x128xi32>
    %28 = arith.cmpi sge, %26, %27 : vector<8x128xi32>
    %c4_i32 = arith.constant 4 : i32
    %29 = vector.broadcast %c4_i32 : i32 to vector<8x128xi32>
    %30 = arith.cmpi slt, %26, %29 : vector<8x128xi32>
    %31 = arith.andi %28, %30 : vector<8x128xi1>
    %32 = arith.select %31, %25, %17 : vector<8x128xi1>, vector<8x128xf32>
    %c0_17 = arith.constant 0 : index
    %c0_18 = arith.constant 0 : index
    %33 = vector.load %arg8[%c0_17, %c0_18] : memref<8x128xf32, #tpu.memory_space<vmem>>, vector<8x128xf32>
    tpu.vector_store %arg8[%c0_17, %c0_18], %32 {strides = array<i32>} : memref<8x128xf32, #tpu.memory_space<vmem>>, vector<8x128xf32>,
    return
  }
  func.func @transform_0(%arg0: i32) -> (i32, i32) {
    %c0_i32 = arith.constant 0 : i32
    %c0_i32_0 = arith.constant 0 : i32
    return %arg0, %c0_i32 : i32, i32
  }
  func.func @transform_1(%arg0: i32) -> (i32, i32) {
    %c0_i32 = arith.constant 0 : i32
    %c0_i32_0 = arith.constant 0 : i32
    %c0_i32_1 = arith.constant 0 : i32
    return %c0_i32, %c0_i32_0 : i32, i32
  }
  func.func @transform_2(%arg0: i32) -> (i32, i32) {
    %c0_i32 = arith.constant 0 : i32
    %c0_i32_0 = arith.constant 0 : i32
    %c0_i32_1 = arith.constant 0 : i32
    return %c0_i32, %c0_i32_0 : i32, i32
  }
  func.func @transform_3(%arg0: i32) -> (i32, i32) {
    %c0_i32 = arith.constant 0 : i32
    %c0_i32_0 = arith.constant 0 : i32
    %c0_i32_1 = arith.constant 0 : i32
    return %c0_i32, %c0_i32_0 : i32, i32
  }
  func.func @transform_4(%arg0: i32) -> (i32, i32) {
    %c0_i32 = arith.constant 0 : i32
    %c0_i32_0 = arith.constant 0 : i32
    %c0_i32_1 = arith.constant 0 : i32
    return %c0_i32, %c0_i32_0 : i32, i32
  }
  func.func @transform_5(%arg0: i32) -> (i32, i32) {
    %c0_i32 = arith.constant 0 : i32
    %c0_i32_0 = arith.constant 0 : i32
    %c0_i32_1 = arith.constant 0 : i32
    return %c0_i32, %c0_i32_0 : i32, i32
  }
  func.func @transform_6(%arg0: i32) -> (i32, i32) {
    %c0_i32 = arith.constant 0 : i32
    %c0_i32_0 = arith.constant 0 : i32
    %c0_i32_1 = arith.constant 0 : i32
    return %c0_i32, %c0_i32_0 : i32, i32
  }
  func.func @transform_7(%arg0: i32) -> (i32, i32) {
    %c0_i32 = arith.constant 0 : i32
    %c0_i32_0 = arith.constant 0 : i32
    return %arg0, %c0_i32 : i32, i32
  }
}

</mosaic_0001>

<bundles_post_ra>
// kernel: tpu_custom_call.1
= control target key start
LH: loop header
LB: loop body
LE: loop exit
PB: predicated region body
PF: predicated region fallthrough
CT: control target
= control target key end

     0   :  { %12 = vsyncpa [#allocation3], 0  ;;  %s370_s0 = inlined_call_operand.vmem [shape: f32[8,4], index: 0, kind: input, shape index: {}]   ;;  %s371_s1 = inlined_call_operand.vmem [shape: f32[4,32], index: 1, kind: input, shape index: {}]   ;;  %s372_s2 = inlined_call_operand.vmem [shape: f32[1,32], index: 2, kind: input, shape index: {}]   ;;  %s373_s3 = inlined_call_operand.hbm [shape: f32[32,64], index: 3, kind: input, shape index: {}]   ;;  %s374_s4 = inlined_call_operand.vmem [shape: f32[1,64], index: 4, kind: input, shape index: {}]   ;;  %s375_s5 = inlined_call_operand.hbm [shape: f32[64,128], index: 5, kind: input, shape index: {}]   ;;  %s376_s6 = inlined_call_operand.vmem [shape: f32[1,128], index: 6, kind: input, shape index: {}]   ;;  %s377_s7 = inlined_call_operand.hbm [shape: f32[8,128], index: 7, kind: output, shape index: {}]  }
   0x1   :  { %13 = vsyncpa [#allocation6], 0 }
   0x2   :  { %14 = vsyncpa [#allocation4], 0  ;;  %s25_s26 = sshll.u32 %s373_s3, 4  ;;  %s301_s27 = smov [#allocation2]   ;;  %s26_s26 = int_to_ptr.hbm [resolvable:$true] %s25_s26 }
   0x3   :  { %s27_s28 = sshll.u32 %s301_s27, 4  ;;  %s40_s8 = sshll.u32 %s375_s5, 4  ;;  %s28_s28 = int_to_ptr.vmem [resolvable:$true] %s27_s28  ;;  %s41_s8 = int_to_ptr.hbm [resolvable:$true] %s40_s8 }
   0x4   :  { %s302_s9 = smov 128   ;;  %s303_s10 = smov 8  }
   0x5   :  { %33 = dma.hbm_to_vmem [thread:$0]  %s26_s26, 512, %s28_s28, [#allocation3], %s302_s9, %s302_s9, %s303_s10  }
   0x6   :  { %s304_s11 = smov [#allocation5]  }
   0x7   :  { %s42_s12 = sshll.u32 %s304_s11, 4  ;;  %s43_s12 = int_to_ptr.vmem [resolvable:$true] %s42_s12 }
   0x8   :  { %48 = dma.hbm_to_vmem [thread:$0]  %s41_s8, 1024, %s43_s12, [#allocation6], %s302_s9, %s302_s9, %s303_s10  }
   0x9   :  { %295 = dma.done.wait [#allocation3], 512  }
   0xa   :  { %296 = vsyncadd [#allocation3], 4294966784 }
   0xb   :  { %297 = dma.done.wait [#allocation6], 1024  }
   0xc   :  { %298 = vsyncadd [#allocation6], 4294966272  ;;  %vm69_vm0 = vcmask 1043456   ;;  %vm65_vm1 = vcmask 31744   ;;  %v60_v0 = vld [vmem:[%s371_s1] sm:$0xf]  ;;  %v178_v30 = vlaneseq }
   0xd   :  { %v59_v1 = vld [vmem:[%s370_s0] sm:$0xff]  ;;  %203 = vmatpush.msk.msra.mxu0 %vm69_vm0, %v60_v0  ;;  %v97_v2 = vld [vmem:[#allocation2 + $0x18] sm:$0xff]  ;;  %v96_v3 = vld [vmem:[#allocation2 + $0x10] sm:$0xff]  ;;  %vm102_vm2 = vcmask 261120   ;;  %vm139_vm3 = vcmask 523264   ;;  %s192_s20 = sshll.u32 %s377_s7, 4  ;;  %s193_s20 = int_to_ptr.hbm [resolvable:$true] %s192_s20 }
   0xe   :  { %204 = vmatmul.msk.f32.vlgmr.msra.gmra.mxu0 %vm65_vm1, %v59_v1  ;;  %118 = vmatpush.msra.mxu1 %v97_v2  ;;  %v95_v4 = vld [vmem:[#allocation2 + $0x8] sm:$0xff]  ;;  %v94_v5 = vld [vmem:[#allocation2] sm:$0xff]  ;;  %v134_v6 = vld [vmem:[#allocation5 + $0x38] sm:$0xff]  ;;  %v179_v32 = vand.u32 127, %v178_v30 }
   0xf   :  { %v133_v7 = vld [vmem:[#allocation5 + $0x30] sm:$0xff]  ;;  %151 = vmatpush.msra.mxu2 %v134_v6  ;;  %v132_v8 = vld [vmem:[#allocation5 + $0x28] sm:$0xff]  ;;  %v212_v9 = vld [vmem:[%s372_s2] ss:$0 sm:$0xff] }
  0x10   :  { %119 = vmatpush.msra.mxu1 %v96_v3  ;;  %v131_v13 = vld [vmem:[#allocation5 + $0x20] sm:$0xff]  ;;  %v130_v14 = vld [vmem:[#allocation5 + $0x18] sm:$0xff]  ;;  %v129_v15 = vld [vmem:[#allocation5 + $0x10] sm:$0xff]  ;;  %vm180_vm4 = vcmp.ge.s32.totalorder %v179_v32, 2  ;;  %vm181_vm5 = vcmp.lt.s32.totalorder %v179_v32, 4 }
  0x11   :  { %152 = vmatpush.msra.mxu2 %v133_v7  ;;  %v128_v16 = vld [vmem:[#allocation5 + $0x8] sm:$0xff]  ;;  %v127_v17 = vld [vmem:[#allocation5] sm:$0xff]  ;;  %vm182_vm7 = vmand %vm180_vm4, %vm181_vm5 }
  0x12   :  { %120 = vmatpush.msra.mxu1 %v95_v4  ;;  %v213_v18 = vld [vmem:[%s374_s4] ss:$0 sm:$0xff]  ;;  %s305_s4 = smov [#allocation7]  }
  0x13   :  { %153 = vmatpush.msra.mxu2 %v132_v8  ;;  %v214_v22 = vld [vmem:[%s376_s6] ss:$0 sm:$0xff]  ;;  %s190_s6 = sshll.u32 %s305_s4, 4  ;;  %s191_s6 = int_to_ptr.vmem [resolvable:$true] %s190_s6 }
  0x14   :  { %121 = vmatpush.msra.mxu1 %v94_v5 }
  0x15   :  { %154 = vmatpush.msra.mxu2 %v131_v13 }
  0x17   :  { %155 = vmatpush.msra.mxu2 %v130_v14 }
  0x19   :  { %156 = vmatpush.msra.mxu2 %v129_v15 }
  0x1b   :  { %157 = vmatpush.msra.mxu2 %v128_v16 }
  0x1d   :  { %158 = vmatpush.msra.mxu2 %v127_v17 }
  0x8b   :  { %v90_v10 = vpop.f32.mrf.mxu0 }
  0x8c   :  { %v91_v11 = vadd.f32 %v212_v9, %v90_v10 }
  0x8e   :  { %215 = vtanh.f32 %v91_v11 }
  0x94   :  { %v216_v12 = vpop.eup %215 }
  0x95   :  { %205 = vmatmul.msk.f32.vlgmr.msra.gmra.mxu1 %vm102_vm2, %v216_v12 }
 0x112   :  { %v123_v19 = vpop.f32.mrf.mxu1 }
 0x113   :  { %v124_v20 = vadd.f32 %v213_v18, %v123_v19 }
 0x115   :  { %217 = vtanh.f32 %v124_v20 }
 0x11b   :  { %v218_v21 = vpop.eup %217 }
 0x11c   :  { %206 = vmatmul.msk.f32.vlgmr.msra.gmra.mxu2 %vm139_vm3, %v218_v21 }
 0x19f   :  { %v160_v23 = vpop.f32.mrf.mxu2 }
 0x1a0   :  { %v161_v24 = vadd.f32 %v214_v22, %v160_v23 }
 0x1a2   :  { %v164_v25 = vand.u32 2147483647, %v161_v24  ;;  %v163_v38 = vmax.f32 %v161_v24, 0.0 }
 0x1a4   :  { %v165_v26 = vsub.f32 0.0, %v164_v25 }
 0x1a6   :  { %v166_v27 = vmul.f32 1.442695, %v165_v26 }
 0x1a8   :  { %219 = vpow2.f32 %v166_v27 }
 0x1ae   :  { %v220_v28 = vpop.eup %219 }
 0x1af   :  { %v168_v29 = vadd.f32 1.0, %v220_v28  ;;  %v171_v31 = vmul.f32 -0.5, %v220_v28  ;;  %v174_v34 = vand.u32 2147483647, %v220_v28 }
 0x1b1   :  { %221 = vlog2.f32 %v168_v29  ;;  %v172_v33 = vadd.f32 1.0, %v171_v31  ;;  %vm175_vm6 = vcmp.lt.f32.partialorder %v174_v34, 0.0004427343 }
 0x1b3   :  { %v173_v37 = vmul.f32 %v220_v28, %v172_v33 }
 0x1b7   :  { %v222_v35 = vpop.eup %221 }
 0x1b8   :  { %v170_v36 = vmul.f32 0.6931472, %v222_v35 }
 0x1ba   :  { %v176_v39 = vsel %vm175_vm6, %v173_v37, %v170_v36 }
 0x1bb   :  { %v177_v40 = vadd.f32 %v176_v39, %v163_v38 }
 0x1bd   :  { %v183_v41 = vsel %vm182_vm7, %v177_v40, %v161_v24 }
 0x1be   :  { %184 = vst [vmem:[#allocation7] sm:$0xff] %v183_v41 }
 0x1bf   :  { %195 = dma.vmem_to_hbm [thread:$0]  %s191_s6, 128, %s193_s20, [#allocation4]  }
 0x1c0   :  { %299 = dma.done.wait [#allocation4], 128  }
 0x1c1   :  { %300 = vsyncadd [#allocation4], 4294967168 }
 0x1c2   :  { %200 = vsyncpa [#allocation3], 1 }
 0x1c3   :  { %201 = vsyncpa [#allocation6], 1 }
 0x1c4   :  { %202 = vsyncpa [#allocation4], 1 }

</bundles_post_ra>
